<compile_context>
chip_gen: v6e
topology: v6e:2x2x1
jax: 0.10.0
libtpu: 0.0.40
codegen_flags: <defaults>
</compile_context>

<pallas_src>
import functools

import jax
import jax.numpy as jnp
from jax.experimental import pallas as pl
from jax.experimental.pallas import tpu as pltpu

_LANE = 128  # vreg lane width (last dim)


def _round_up(x, m):
    return (x + m - 1) // m * m


def _sublane(dtype):
    # sub-32-bit dtypes pack rows along sublanes: 8 (f32) / 16 (bf16) / 32 (int8, fp8)
    return {4: 8, 2: 16, 1: 32}.get(jnp.dtype(dtype).itemsize, 8)


def _vmem_budget_bytes():
    """Usable VMEM: physical capacity minus headroom for Mosaic scratch/semaphores."""
    try:
        cap = int(pltpu.get_tpu_info().vmem_capacity_bytes)
    except Exception:
        cap = 64 << 20  # conservative fallback (v7x has 64 MiB per TensorCore)
    return min(cap - (8 << 20), int(cap * 0.85))


def _max_block_m():
    # v5e: 4x128^2 MXU and a single vst slot -> 512-row tiles gain nothing and
    # just eat VMEM that could hold resident weights.
    try:
        kind = jax.devices()[0].device_kind.lower()
    except Exception:
        kind = ""
    if "v5 lite" in kind or "v5e" in kind or "v5lite" in kind:
        return 256
    return 512


def _mlp_fused_kernel(x_ref, w1_ref, b1_ref, w2_ref, b2_ref, o_ref, *, compute_dtype):
    x = x_ref[...]
    if compute_dtype is not None:
        x = x.astype(compute_dtype)
    h = jnp.dot(x, w1_ref[...], preferred_element_type=jnp.float32)
    # bias + ReLU kept in f32 (v5e has no bf16 VPU)
    h = jnp.maximum(h + b1_ref[...].astype(jnp.float32), 0.0)
    h = h.astype(w2_ref.dtype if compute_dtype is None else compute_dtype)
    y = jnp.dot(h, w2_ref[...], preferred_element_type=jnp.float32)
    o_ref[...] = (y + b2_ref[...].astype(jnp.float32)).astype(o_ref.dtype)


def _mlp_split_kernel(x_ref, w1_ref, b1_ref, w2_ref, b2_ref, o_ref, acc_ref, *,
                      compute_dtype):
    # Grid: (batch tile i [parallel], hidden chunk k [arbitrary, innermost]).
    k = pl.program_id(1)

    @pl.when(k == 0)
    def _():
        acc_ref[...] = jnp.zeros_like(acc_ref)

    x = x_ref[...]
    if compute_dtype is not None:
        x = x.astype(compute_dtype)
    h = jnp.dot(x, w1_ref[...], preferred_element_type=jnp.float32)
    h = jnp.maximum(h + b1_ref[...].astype(jnp.float32), 0.0)
    h = h.astype(w2_ref.dtype if compute_dtype is None else compute_dtype)
    acc_ref[...] += jnp.dot(h, w2_ref[...], preferred_element_type=jnp.float32)

    @pl.when(k == pl.num_programs(1) - 1)
    def _():
        o_ref[...] = (acc_ref[...] + b2_ref[...].astype(jnp.float32)).astype(o_ref.dtype)


def two_layer_net(x, w1, b1, w2, b2, *, block_m=None, block_h=None,
                  compute_dtype=None, force_hidden_split=False):
    """Fused two-layer MLP forward pass.

    x:  (B, n_input)
    w1: (n_input, n_hidden),  b1: (n_hidden,)
    w2: (n_hidden, n_output), b2: (n_output,)
    returns (B, n_output)
    """
    B, n_input = x.shape
    assert w1.shape[0] == n_input
    n_hidden = w1.shape[1]
    assert w2.shape[0] == n_hidden
    n_output = w2.shape[1]

    out_dtype = x.dtype
    x_bytes = jnp.dtype(x.dtype).itemsize
    o_bytes = jnp.dtype(out_dtype).itemsize
    w_bytes = jnp.dtype(w1.dtype).itemsize
    b_bytes = jnp.dtype(b1.dtype).itemsize

    sub = _sublane(x.dtype)
    budget = _vmem_budget_bytes()

    # ---- batch tile: feed the MXU (>=128 rows when B allows) but keep >=4
    #      grid steps for large B so both v7x TensorCores pipeline DMA.
    if block_m is None:
        if B <= 128:
            block_m = max(sub, _round_up(B, sub))
        else:
            block_m = max(128, min(_max_block_m(), _round_up(pl.cdiv(B, 4), 128)))
    block_m = max(sub, _round_up(block_m, sub))

    n_hidden_p = _round_up(n_hidden, _LANE)

    def fused_vmem(bm):
        weights = (n_input * n_hidden_p + n_hidden_p * n_output) * w_bytes
        biases = (n_hidden_p + n_output) * b_bytes
        io = 2 * bm * n_input * x_bytes + 2 * bm * n_output * o_bytes
        h = bm * n_hidden_p * 4  # f32 intermediate
        return weights + biases + io + 2 * h

    def split_vmem(bm, bh):
        w_chunks = 2 * (n_input * bh + bh * n_output) * w_bytes  # double-buffered
        biases = 2 * bh * b_bytes + n_output * b_bytes
        io = 2 * bm * n_input * x_bytes + 2 * bm * n_output * o_bytes
        acc = bm * n_output * 4
        h = bm * bh * 4
        return w_chunks + biases + io + acc + 2 * h

    if block_h is not None or force_hidden_split:
        use_split = True
    else:
        use_split = fused_vmem(block_m) > budget
        if use_split:
            # Shrink the batch tile first (never below 128) before splitting.
            while block_m > 128 and fused_vmem(block_m) > budget:
                block_m = max(128, _round_up(block_m // 2, sub))
            use_split = fused_vmem(block_m) > budget

    if use_split:
        if block_h is None:
            block_h = _LANE
            for cand in (2048, 1024, 512, 256, 128):
                if cand <= n_hidden_p and split_vmem(block_m, cand) <= budget:
                    block_h = cand
                    break
        block_h = max(_LANE, _round_up(block_h, _LANE))
        n_hidden_p = _round_up(n_hidden, block_h)

    # ---- cheap one-time weight/bias padding of the hidden dim (exact: padded
    #      hidden units have zero weight+bias -> relu(0)=0 contributes 0).
    #      x and the output are NOT padded (no extra activation HBM traffic).
    w1_p = jnp.pad(w1, ((0, 0), (0, n_hidden_p - n_hidden)))
    w2_p = jnp.pad(w2, ((0, n_hidden_p - n_hidden), (0, 0)))
    b1_p = jnp.pad(b1, (0, n_hidden_p - n_hidden)).reshape(1, n_hidden_p)
    b2_p = b2.reshape(1, n_output)

    cost = pl.CostEstimate(
        flops=2 * B * (n_input * n_hidden_p + n_hidden_p * n_output),
        transcendentals=0,
        bytes_accessed=B * n_input * x_bytes + B * n_output * o_bytes
        + (n_input * n_hidden_p + n_hidden_p * n_output) * w_bytes
        + (n_hidden_p + n_output) * b_bytes,
    )

    grid_m = pl.cdiv(B, block_m)  # partial last block handled by Pallas masking
    resident = pl.Buffered(1)     # block index never changes -> single buffer

    if not use_split:
        est = fused_vmem(block_m)
        grid = (grid_m,)
        kernel = functools.partial(_mlp_fused_kernel, compute_dtype=compute_dtype)
        in_specs = [
            pl.BlockSpec((block_m, n_input), lambda i: (i, 0)),               # x tile
            pl.BlockSpec((n_input, n_hidden_p), lambda i: (0, 0),             # W1 resident
                         pipeline_mode=resident),
            pl.BlockSpec((1, n_hidden_p), lambda i: (0, 0),                   # b1
                         pipeline_mode=resident),
            pl.BlockSpec((n_hidden_p, n_output), lambda i: (0, 0),            # W2 resident
                         pipeline_mode=resident),
            pl.BlockSpec((1, n_output), lambda i: (0, 0),                     # b2
                         pipeline_mode=resident),
        ]
        out_spec = pl.BlockSpec((block_m, n_output), lambda i: (i, 0))
        scratch = []
        dims = ("parallel",)
    else:
        est = split_vmem(block_m, block_h)
        grid = (grid_m, n_hidden_p // block_h)
        kernel = functools.partial(_mlp_split_kernel, compute_dtype=compute_dtype)
        in_specs = [
            pl.BlockSpec((block_m, n_input), lambda i, k: (i, 0)),            # x tile
            pl.BlockSpec((n_input, block_h), lambda i, k: (0, k)),            # W1 chunk
            pl.BlockSpec((1, block_h), lambda i, k: (0, k)),                  # b1 chunk
            pl.BlockSpec((block_h, n_output), lambda i, k: (k, 0)),           # W2 chunk
            pl.BlockSpec((1, n_output), lambda i, k: (0, 0),                  # b2
                         pipeline_mode=resident),
        ]
        out_spec = pl.BlockSpec((block_m, n_output), lambda i, k: (i, 0))
        scratch = [pltpu.VMEM((block_m, n_output), jnp.float32)]
        dims = ("parallel", "arbitrary")

    vmem_limit = int(min(budget, max(32 << 20, est * 5 // 4)))

    out = pl.pallas_call(
        kernel,
        out_shape=jax.ShapeDtypeStruct((B, n_output), out_dtype),
        grid_spec=pltpu.PrefetchScalarGridSpec(
            num_scalar_prefetch=0,
            grid=grid,
            in_specs=in_specs,
            out_specs=out_spec,
            scratch_shapes=scratch,
        ),
        compiler_params=pltpu.CompilerParams(
            dimension_semantics=dims,
            vmem_limit_bytes=vmem_limit,
        ),
        cost_estimate=cost,
    )(x, w1_p, b1_p, w2_p, b2_p)

    return out


def _init_linear(key, fan_in, fan_out, dtype=jnp.float32):
    """Deterministic init mimicking torch.nn.Linear default (U(-1/sqrt(fan_in), +))."""
    kw, kb = jax.random.split(key)
    bound = 1.0 / jnp.sqrt(jnp.asarray(fan_in, dtype))
    # stored already transposed: (fan_in, fan_out)
    w = jax.random.uniform(kw, (fan_in, fan_out), dtype, -bound, bound)
    b = jax.random.uniform(kb, (fan_out,), dtype, -bound, bound)
    return w, b


def _reference(x, w1, b1, w2, b2):
    h = jnp.maximum(x @ w1 + b1, 0.0)
    return h @ w2 + b2


if __name__ == "__main__":
    key = jax.random.PRNGKey(0)
    kx, k1, k2, k3 = jax.random.split(key, 4)

    # --- Test 1: default fused path (TwoLayerNet(32, 64, 16), B=16) ---
    B, n_input, n_hidden, n_output = 16, 32, 64, 16
    x = jax.random.normal(kx, (B, n_input), jnp.float32)
    w1, b1 = _init_linear(k1, n_input, n_hidden)
    w2, b2 = _init_linear(k2, n_hidden, n_output)

    y = jax.block_until_ready(two_layer_net(x, w1, b1, w2, b2))
    y_ref = _reference(x, w1, b1, w2, b2)
    assert y.shape == (B, n_output)
    assert jnp.allclose(y, y_ref, atol=1e-5, rtol=1e-5), "fused path mismatch"

    # --- Test 2: hidden-split (reduction over n_hidden) path, forced small ---
    B2, n_in2, n_hid2, n_out2 = 24, 48, 256, 16
    kx2, k4, k5 = jax.random.split(k3, 3)
    x2 = jax.random.normal(kx2, (B2, n_in2), jnp.float32)
    w1b, b1b = _init_linear(k4, n_in2, n_hid2)
    w2b, b2b = _init_linear(k5, n_hid2, n_out2)

    y2 = jax.block_until_ready(
        two_layer_net(x2, w1b, b1b, w2b, b2b, block_h=128, force_hidden_split=True))
    y2_ref = _reference(x2, w1b, b1b, w2b, b2b)
    assert y2.shape == (B2, n_out2)
    assert jnp.allclose(y2, y2_ref, atol=1e-5, rtol=1e-5), "split path mismatch"

    print("KERNEL_OK")
</pallas_src>

<mosaic_0001>
module attributes {stable_mosaic.version = 11 : i64} {
  func.func @_mlp_fused_kernel(%arg0: i32, %arg1: memref<16x32xf32, #tpu.memory_space<vmem>>, %arg2: memref<32x128xf32, #tpu.memory_space<vmem>>, %arg3: memref<1x128xf32, #tpu.memory_space<vmem>>, %arg4: memref<128x16xf32, #tpu.memory_space<vmem>>, %arg5: memref<1x16xf32, #tpu.memory_space<vmem>>, %arg6: memref<16x16xf32, #tpu.memory_space<vmem>>) attributes {dimension_semantics = [#tpu.dimension_semantics<parallel>], iteration_bounds = array<i64: 1>, scalar_prefetch = 0 : i64, scratch_operands = 0 : i64, tpu.core_type = #tpu.core_type<tc>, window_params = [{transform_indices = @transform_0, window_bounds = array<i64: 16, 32>}, {pipeline_mode = #tpu.pipeline_mode<synchronous>, transform_indices = @transform_1, window_bounds = array<i64: 32, 128>}, {pipeline_mode = #tpu.pipeline_mode<synchronous>, transform_indices = @transform_2, window_bounds = array<i64: 1, 128>}, {pipeline_mode = #tpu.pipeline_mode<synchronous>, transform_indices = @transform_3, window_bounds = array<i64: 128, 16>}, {pipeline_mode = #tpu.pipeline_mode<synchronous>, transform_indices = @transform_4, window_bounds = array<i64: 1, 16>}, {transform_indices = @transform_5, window_bounds = array<i64: 16, 16>}]} {
    %c0 = arith.constant 0 : index
    %c0_0 = arith.constant 0 : index
    %0 = vector.load %arg1[%c0, %c0_0] : memref<16x32xf32, #tpu.memory_space<vmem>>, vector<16x32xf32>
    %c0_1 = arith.constant 0 : index
    %c0_2 = arith.constant 0 : index
    %1 = vector.load %arg2[%c0_1, %c0_2] : memref<32x128xf32, #tpu.memory_space<vmem>>, vector<32x128xf32>
    %cst = arith.constant dense<0.000000e+00> : vector<16x128xf32>
    %2 = tpu.matmul %0, %1, %cst {dimension_numbers = #tpu.dot_dimension_numbers<[1], [0], [0], [1], [0, 0, 1, 1], [], []>} : vector<16x32xf32>, vector<32x128xf32>, vector<16x128xf32> -> vector<16x128xf32>
    %c0_3 = arith.constant 0 : index
    %c0_4 = arith.constant 0 : index
    %3 = vector.load %arg3[%c0_3, %c0_4] : memref<1x128xf32, #tpu.memory_space<vmem>>, vector<1x128xf32>
    %4 = vector.broadcast %3 : vector<1x128xf32> to vector<16x128xf32>
    %5 = arith.addf %2, %4 : vector<16x128xf32>
    %cst_5 = arith.constant 0.000000e+00 : f32
    %6 = vector.broadcast %cst_5 : f32 to vector<16x128xf32>
    %7 = arith.maximumf %5, %6 : vector<16x128xf32>
    %c0_6 = arith.constant 0 : index
    %c0_7 = arith.constant 0 : index
    %8 = vector.load %arg4[%c0_6, %c0_7] : memref<128x16xf32, #tpu.memory_space<vmem>>, vector<128x16xf32>
    %cst_8 = arith.constant dense<0.000000e+00> : vector<16x16xf32>
    %9 = tpu.matmul %7, %8, %cst_8 {dimension_numbers = #tpu.dot_dimension_numbers<[1], [0], [0], [1], [0, 0, 1, 1], [], []>} : vector<16x128xf32>, vector<128x16xf32>, vector<16x16xf32> -> vector<16x16xf32>
    %c0_9 = arith.constant 0 : index
    %c0_10 = arith.constant 0 : index
    %10 = vector.load %arg5[%c0_9, %c0_10] : memref<1x16xf32, #tpu.memory_space<vmem>>, vector<1x16xf32>
    %11 = vector.broadcast %10 : vector<1x16xf32> to vector<16x16xf32>
    %12 = arith.addf %9, %11 : vector<16x16xf32>
    %c0_11 = arith.constant 0 : index
    %c0_12 = arith.constant 0 : index
    %13 = vector.load %arg6[%c0_11, %c0_12] : memref<16x16xf32, #tpu.memory_space<vmem>>, vector<16x16xf32>
    tpu.vector_store %arg6[%c0_11, %c0_12], %12 {strides = array<i32>} : memref<16x16xf32, #tpu.memory_space<vmem>>, vector<16x16xf32>,
    return
  }
  func.func @transform_0(%arg0: i32) -> (i32, i32) {
    %c0_i32 = arith.constant 0 : i32
    %c0_i32_0 = arith.constant 0 : i32
    return %arg0, %c0_i32 : i32, i32
  }
  func.func @transform_1(%arg0: i32) -> (i32, i32) {
    %c0_i32 = arith.constant 0 : i32
    %c0_i32_0 = arith.constant 0 : i32
    %c0_i32_1 = arith.constant 0 : i32
    return %c0_i32, %c0_i32_0 : i32, i32
  }
  func.func @transform_2(%arg0: i32) -> (i32, i32) {
    %c0_i32 = arith.constant 0 : i32
    %c0_i32_0 = arith.constant 0 : i32
    %c0_i32_1 = arith.constant 0 : i32
    return %c0_i32, %c0_i32_0 : i32, i32
  }
  func.func @transform_3(%arg0: i32) -> (i32, i32) {
    %c0_i32 = arith.constant 0 : i32
    %c0_i32_0 = arith.constant 0 : i32
    %c0_i32_1 = arith.constant 0 : i32
    return %c0_i32, %c0_i32_0 : i32, i32
  }
  func.func @transform_4(%arg0: i32) -> (i32, i32) {
    %c0_i32 = arith.constant 0 : i32
    %c0_i32_0 = arith.constant 0 : i32
    %c0_i32_1 = arith.constant 0 : i32
    return %c0_i32, %c0_i32_0 : i32, i32
  }
  func.func @transform_5(%arg0: i32) -> (i32, i32) {
    %c0_i32 = arith.constant 0 : i32
    %c0_i32_0 = arith.constant 0 : i32
    return %arg0, %c0_i32 : i32, i32
  }
}

</mosaic_0001>

<bundles_post_ra>
// kernel: tpu_custom_call.1
= control target key start
LH: loop header
LB: loop body
LE: loop exit
PB: predicated region body
PF: predicated region fallthrough
CT: control target
= control target key end

     0   :  { %vm34_vm0 = vcmask 261120   ;;  %s444_s0 = inlined_call_operand.vmem [shape: f32[16,32], index: 0, kind: input, shape index: {}]   ;;  %s445_s1 = inlined_call_operand.vmem [shape: f32[32,128], index: 1, kind: input, shape index: {}]   ;;  %s446_s2 = inlined_call_operand.vmem [shape: f32[1,128], index: 2, kind: input, shape index: {}]   ;;  %s447_s3 = inlined_call_operand.vmem [shape: f32[128,16], index: 3, kind: input, shape index: {}]   ;;  %s448_s4 = inlined_call_operand.vmem [shape: f32[1,16], index: 4, kind: input, shape index: {}]   ;;  %s449_s5 = inlined_call_operand.hbm [shape: f32[16,16], index: 5, kind: output, shape index: {}]  }
   0x1   :  { %v26_v0 = vld [vmem:[%s445_s1 + $0x18] sm:$0xff]  ;;  %v25_v1 = vld [vmem:[%s445_s1 + $0x10] sm:$0xff]  ;;  %v21_v2 = vld [vmem:[%s444_s0] sm:$0xff] }
   0x2   :  { %263 = vmatprep.subr.mxu0 %v26_v0  ;;  %v24_v3 = vld [vmem:[%s445_s1 + $0x8] sm:$0xff]  ;;  %271 = vmatprep.mubr.msk.f32.mxu0 %vm34_vm0, %v21_v2  ;;  %v133_v4 = vld [vmem:[%s447_s3 + $0x78] sm:$0xff]  ;;  %v132_v5 = vld [vmem:[%s447_s3 + $0x70] sm:$0xff] }
   0x3   :  { %264 = vmatpush3.msra.mxu0 %v26_v0  ;;  %274 = vmatprep.subr.mxu1 %v133_v4  ;;  %v23_v6 = vld [vmem:[%s445_s1] sm:$0xff]  ;;  %v131_v7 = vld [vmem:[%s447_s3 + $0x68] sm:$0xff] }
   0x4   :  { %265 = vmatprep.subr.mxu0 %v25_v1  ;;  %275 = vmatpush3.msra.mxu1 %v133_v4  ;;  %v22_v8 = vld [vmem:[%s444_s0 + $0x8] sm:$0xff]  ;;  %v130_v9 = vld [vmem:[%s447_s3 + $0x60] sm:$0xff] }
   0x5   :  { %266 = vmatpush3.msra.mxu0 %v25_v1  ;;  %276 = vmatprep.subr.mxu1 %v132_v5 }
   0x6   :  { %267 = vmatprep.subr.mxu0 %v24_v3  ;;  %277 = vmatpush3.msra.mxu1 %v132_v5 }
   0x7   :  { %268 = vmatpush3.msra.mxu0 %v24_v3 }
   0x8   :  { %10 = vsyncpa [#allocation3], 0  ;;  %269 = vmatprep.subr.mxu0 %v23_v6  ;;  %278 = vmatprep.subr.mxu1 %v131_v7  ;;  %v129_v10 = vld [vmem:[%s447_s3 + $0x58] sm:$0xff]  ;;  %v128_v11 = vld [vmem:[%s447_s3 + $0x50] sm:$0xff]  ;;  %vm216_vm1 = vcmask 130048  }
   0x9   :  { %270 = vmatpush3.msra.mxu0 %v23_v6  ;;  %279 = vmatpush3.msra.mxu1 %v131_v7  ;;  %v127_v12 = vld [vmem:[%s447_s3 + $0x48] sm:$0xff]  ;;  %v126_v13 = vld [vmem:[%s447_s3 + $0x40] sm:$0xff]  ;;  %v125_v14 = vld [vmem:[%s447_s3 + $0x38] sm:$0xff] }
   0xa   :  { %272 = vmatmul.mubr.msk.f32.vlgmr.msra.gmra.mxu0 %vm34_vm0, %v22_v8  ;;  %280 = vmatprep.subr.mxu1 %v130_v9  ;;  %v124_v15 = vld [vmem:[%s447_s3 + $0x30] sm:$0xff]  ;;  %v123_v16 = vld [vmem:[%s447_s3 + $0x28] sm:$0xff]  ;;  %v122_v17 = vld [vmem:[%s447_s3 + $0x20] sm:$0xff] }
   0xb   :  { %281 = vmatpush3.msra.mxu1 %v130_v9  ;;  %v121_v18 = vld [vmem:[%s447_s3 + $0x18] sm:$0xff]  ;;  %v120_v19 = vld [vmem:[%s447_s3 + $0x10] sm:$0xff]  ;;  %v119_v20 = vld [vmem:[%s447_s3 + $0x8] sm:$0xff] }
   0xc   :  { %282 = vmatprep.subr.mxu1 %v129_v10  ;;  %v118_v21 = vld [vmem:[%s447_s3] sm:$0xff]  ;;  %s334_s3 = smov [#allocation2]  }
   0xd   :  { %283 = vmatpush3.msra.mxu1 %v129_v10  ;;  %v235_v22 = vld [vmem:[%s446_s2] ss:$0 sm:$0xff]  ;;  %s224_s13 = sshll.u32 %s334_s3, 4  ;;  %s225_s13 = int_to_ptr.vmem [resolvable:$true] %s224_s13 }
   0xe   :  { %284 = vmatprep.subr.mxu1 %v128_v11  ;;  %v238_v29 = vld [vmem:[%s448_s4] ss:$0 sm:$0xff]  ;;  %s312_s2 = scalar_lea.vmem %s225_s13, 256  ;;  %p317_p1 = scmp.lt.s32.totalorder %s225_s13, %s225_s13 }
   0xf   :  { %285 = vmatpush3.msra.mxu1 %v128_v11  ;;  %p313_p0 = scmp.ne.s32.totalorder %s225_s13, %s312_s2  ;;  %p318_p2 = scmp.lt.s32.totalorder %s312_s2, %s312_s2 }
  0x10   :  { %286 = vmatprep.subr.mxu1 %v127_v12 }
  0x11   :  { %287 = vmatpush3.msra.mxu1 %v127_v12  ;;  %p319_p3 = por %p318_p2, %p317_p1 }
  0x12   :  { %288 = vmatprep.subr.mxu1 %v126_v13 }
  0x13   :  { %289 = vmatpush3.msra.mxu1 %v126_v13  ;;  %p320_p4 = pnand %p319_p3, %p313_p0 }
  0x14   :  { %290 = vmatprep.subr.mxu1 %v125_v14 }
  0x15   :  { %291 = vmatpush3.msra.mxu1 %v125_v14 }
  0x16   :  { %292 = vmatprep.subr.mxu1 %v124_v15 }
  0x17   :  { %293 = vmatpush3.msra.mxu1 %v124_v15 }
  0x18   :  { %294 = vmatprep.subr.mxu1 %v123_v16 }
  0x19   :  { %295 = vmatpush3.msra.mxu1 %v123_v16 }
  0x1a   :  { %296 = vmatprep.subr.mxu1 %v122_v17 }
  0x1b   :  { %297 = vmatpush3.msra.mxu1 %v122_v17 }
  0x1c   :  { %298 = vmatprep.subr.mxu1 %v121_v18 }
  0x1d   :  { %299 = vmatpush3.msra.mxu1 %v121_v18 }
  0x1e   :  { %300 = vmatprep.subr.mxu1 %v120_v19 }
  0x1f   :  { %301 = vmatpush3.msra.mxu1 %v120_v19 }
  0x20   :  { %302 = vmatprep.subr.mxu1 %v119_v20 }
  0x21   :  { %303 = vmatpush3.msra.mxu1 %v119_v20 }
  0x22   :  { %304 = vmatprep.subr.mxu1 %v118_v21 }
  0x23   :  { %305 = vmatpush3.msra.mxu1 %v118_v21 }
  0xca   :  { %v273_v23 = vpop.f32.mrf.mxu0 }
  0xcb   :  { %v113_v24 = vadd.f32 %v273_v23, %v235_v22 }
  0xcc   :  { %v107_v25 = vpop.f32.mrf.mxu0 }
  0xcd   :  { %v108_v26 = vadd.f32 %v235_v22, %v107_v25  ;;  %v117_v28 = vmax.f32 %v113_v24, 0.0 }
  0xcf   :  { %v116_v27 = vmax.f32 %v108_v26, 0.0 }
  0xd1   :  { %306 = vmatprep.mubr.f32.mxu1 %v116_v27 }
  0xd2   :  { %307 = vmatmul.mubr.f32.vlgmr.msra.gmra.mxu1 %v117_v28 }
 0x192   :  { %v308_v30 = vpop.f32.mrf.mxu1 }
 0x193   :  { %v213_v31 = vadd.f32 %v308_v30, %v238_v29 }
 0x194   :  { %v207_v32 = vpop.f32.mrf.mxu1 }
 0x195   :  { %218 = vst.msk [vmem:[#allocation2 + $0x8] sm:$0xff] %vm216_vm1, %v213_v31  ;;  %v208_v33 = vadd.f32 %v238_v29, %v207_v32 }
 0x197   :  { %217 = vst.msk [vmem:[#allocation2] sm:$0xff] %vm216_vm1, %v208_v33 }
 0x198   :  { %323 = shalt.err (!%p320_p4)
}
 0x199   :  { %s335_s14 = smov 128   ;;  %s336_s0 = smov 8  }
 0x19a   :  { %230 = dma.vmem_to_hbm [thread:$0]  %s225_s13, 256, %s449_s5, [#allocation3], %s335_s14, %s335_s14, %s336_s0  }
 0x19b   :  { %332 = dma.done.wait [#allocation3], 256  }
 0x19c   :  { %333 = vsyncadd [#allocation3], 4294967040 }
 0x19d   :  { %234 = vsyncpa [#allocation3], 1 }

</bundles_post_ra>
